<compile_context>
chip_gen: v6e
topology: v6e:2x2x1
jax: 0.10.0
libtpu: 0.0.40
codegen_flags: <defaults>
</compile_context>

<pallas_src>
import functools

import jax
import jax.numpy as jnp
from jax import lax
from jax.experimental import pallas as pl
from jax.experimental.pallas import tpu as pltpu

_EPS = 1e-12
_LANES = 128
_SUBLANES = 8


def _charbonnier_kernel(x_ref, y_ref, out_ref, acc_ref, *,
                        core1_start, n_blocks, tail_valid, skip_core1_first):
    """Grid = (num_cores, steps_per_core).

    Core `c` walks row-blocks g = c*core1_start + i (always in-bounds).
    acc_ref is a (block_rows, 128) f32 VMEM accumulator (lane-resident sums);
    out_ref is a (1, 1) f32 SMEM slot holding this core's partial sum.
    """
    c = pl.program_id(0)          # core chunk (parallel axis)
    i = pl.program_id(1)          # step within the chunk (sequential axis)
    g = c * core1_start + i       # global row-block index, always < n_blocks

    # Zero the vector accumulator at the start of each core's chunk.
    @pl.when(i == 0)
    def _():
        acc_ref[...] = jnp.zeros_like(acc_ref)

    x = x_ref[...].astype(jnp.float32)
    y = y_ref[...].astype(jnp.float32)
    diff = x - y
    err = jnp.sqrt(diff * diff + jnp.float32(_EPS))

    block_elems = err.shape[0] * err.shape[1]

    def _acc_full():
        acc_ref[...] += err

    def _acc_masked():
        # Only the last real block can contain lane padding / ragged garbage.
        r = lax.broadcasted_iota(jnp.int32, err.shape, 0)
        l = lax.broadcasted_iota(jnp.int32, err.shape, 1)
        local_idx = r * err.shape[1] + l
        acc_ref[...] += jnp.where(local_idx < tail_valid, err, jnp.float32(0.0))

    if tail_valid < block_elems:
        # Last block is partial: mask it, keep all other blocks mask-free.
        is_tail = g == (n_blocks - 1)
        main_cond = jnp.logical_not(is_tail)
        tail_cond = is_tail
        if skip_core1_first:
            owned = jnp.logical_or(c == 0, i > 0)   # core 1 skips its duplicated block
            main_cond = jnp.logical_and(owned, main_cond)
            tail_cond = jnp.logical_and(owned, tail_cond)
        pl.when(main_cond)(_acc_full)
        pl.when(tail_cond)(_acc_masked)
    else:
        # Perfectly aligned input: no masking anywhere.
        if skip_core1_first:
            pl.when(jnp.logical_or(c == 0, i > 0))(_acc_full)
        else:
            _acc_full()

    # Per-core finalize: single cross-lane reduce of the accumulator.
    @pl.when(i == pl.num_programs(1) - 1)
    def _():
        out_ref[0, 0] = jnp.sum(acc_ref[...])


def l1_charbonnier_loss(x: jax.Array, y: jax.Array, *, block_rows: int = 2048) -> jax.Array:
    """Pallas TPU implementation of L1_Charbonnier_loss.forward."""
    assert x.shape == y.shape, "X and Y must have the same shape"
    n_valid = int(x.size)
    assert n_valid > 0

    # Flatten (free for contiguous arrays).  Only pad when the element count
    # is not a multiple of 128 lanes, and then only by < 128 zeros.
    xf = x.reshape(-1)
    yf = y.reshape(-1)
    lane_pad = (-n_valid) % _LANES
    if lane_pad:
        xf = jnp.pad(xf, (0, lane_pad))
        yf = jnp.pad(yf, (0, lane_pad))
    rows = (n_valid + lane_pad) // _LANES
    x2 = xf.reshape(rows, _LANES)
    y2 = yf.reshape(rows, _LANES)

    # Large blocks for any size; a single full-array block for small inputs
    # (block == full dim is always legal regardless of the (8,128) rule).
    if rows <= block_rows:
        block_rows = rows
    n_blocks = pl.cdiv(rows, block_rows)

    # Split the row-blocks across (up to) 2 TensorCores.  If n_blocks is odd,
    # core 1 starts one block early (overlap) and skips that block in-kernel.
    num_cores = 2 if n_blocks >= 2 else 1
    steps = pl.cdiv(n_blocks, num_cores)
    core1_start = n_blocks - steps
    skip_core1_first = (num_cores * steps) != n_blocks

    # Number of valid elements inside the last real block (for the tail mask).
    tail_valid = n_valid - (n_blocks - 1) * block_rows * _LANES

    kernel = functools.partial(
        _charbonnier_kernel,
        core1_start=core1_start,
        n_blocks=n_blocks,
        tail_valid=tail_valid,
        skip_core1_first=skip_core1_first,
    )

    in_bytes = (x.dtype.itemsize + y.dtype.itemsize) * n_valid
    cost = pl.CostEstimate(
        flops=4 * n_valid,            # sub, mul, add, final accumulate
        transcendentals=n_valid,      # sqrt
        bytes_accessed=in_bytes + 4 * num_cores,
    )

    partials = pl.pallas_call(
        kernel,
        out_shape=jax.ShapeDtypeStruct((num_cores, 1), jnp.float32),
        grid_spec=pltpu.PrefetchScalarGridSpec(
            num_scalar_prefetch=0,
            grid=(num_cores, steps),
            in_specs=[
                pl.BlockSpec((block_rows, _LANES),
                             lambda c, i: (c * core1_start + i, 0)),
                pl.BlockSpec((block_rows, _LANES),
                             lambda c, i: (c * core1_start + i, 0)),
            ],
            out_specs=pl.BlockSpec((1, 1), lambda c, i: (c, 0),
                                   memory_space=pltpu.SMEM),
            scratch_shapes=[pltpu.VMEM((block_rows, _LANES), jnp.float32)],
        ),
        compiler_params=pltpu.CompilerParams(
            dimension_semantics=("parallel", "arbitrary"),
            vmem_limit_bytes=32 * 1024 * 1024,
        ),
        cost_estimate=cost,
    )(x2, y2)

    return jnp.sum(partials) / jnp.float32(n_valid)


def _reference(x, y):
    diff = x.astype(jnp.float32) - y.astype(jnp.float32)
    return jnp.mean(jnp.sqrt(diff * diff + _EPS))


if __name__ == "__main__":
    root = jax.random.PRNGKey(0)

    # (shape, block_rows): cover the zero-copy aligned path, the lane-pad +
    # tail-mask path, and (via a small block_rows override) the multi-block /
    # 2-core-split / odd-block-count / ragged-tail path.
    cases = [
        ((2, 4, 16, 16), 2048),
        ((2, 3, 15, 17), 2048),
        ((2, 5, 21, 24), 16),
    ]
    for idx, (shape, br) in enumerate(cases):
        kx, ky = jax.random.split(jax.random.fold_in(root, idx))
        x = jax.random.normal(kx, shape, dtype=jnp.float32)
        y = jax.random.normal(ky, shape, dtype=jnp.float32)

        loss = jax.block_until_ready(l1_charbonnier_loss(x, y, block_rows=br))
        ref = jax.block_until_ready(_reference(x, y))

        assert loss.shape == (), f"expected scalar, got {loss.shape}"
        assert jnp.allclose(loss, ref, rtol=1e-5, atol=1e-6), (shape, loss, ref)

    print("KERNEL_OK")
</pallas_src>

<mosaic_0001>
module attributes {stable_mosaic.version = 11 : i64} {
  func.func @_charbonnier_kernel(%arg0: i32, %arg1: i32, %arg2: memref<16x128xf32, #tpu.memory_space<vmem>>, %arg3: memref<16x128xf32, #tpu.memory_space<vmem>>, %arg4: memref<1x1xf32, #tpu.memory_space<smem>>, %arg5: memref<16x128xf32, #tpu.memory_space<vmem>>) attributes {dimension_semantics = [#tpu.dimension_semantics<parallel>, #tpu.dimension_semantics<arbitrary>], iteration_bounds = array<i64: 1, 1>, scalar_prefetch = 0 : i64, scratch_operands = 1 : i64, tpu.core_type = #tpu.core_type<tc>, window_params = [{transform_indices = @transform_0, window_bounds = array<i64: 16, 128>}, {transform_indices = @transform_1, window_bounds = array<i64: 16, 128>}, {transform_indices = @transform_2, window_bounds = array<i64: 1, 1>}]} {
    %c0_i32 = arith.constant 0 : i32
    %0 = arith.cmpi eq, %arg1, %c0_i32 : i32
    %1 = arith.extui %0 : i1 to i32
    %c0_i32_0 = arith.constant 0 : i32
    %2 = arith.cmpi ne, %1, %c0_i32_0 : i32
    scf.if %2 {
      %cst_10 = arith.constant 0.000000e+00 : f32
      %16 = vector.broadcast %cst_10 : f32 to vector<16x128xf32>
      %c0_11 = arith.constant 0 : index
      %c0_12 = arith.constant 0 : index
      %17 = vector.load %arg5[%c0_11, %c0_12] : memref<16x128xf32, #tpu.memory_space<vmem>>, vector<16x128xf32>
      tpu.vector_store %arg5[%c0_11, %c0_12], %16 {strides = array<i32>} : memref<16x128xf32, #tpu.memory_space<vmem>>, vector<16x128xf32>,
    } else {
    }
    %c0 = arith.constant 0 : index
    %c0_1 = arith.constant 0 : index
    %3 = vector.load %arg2[%c0, %c0_1] : memref<16x128xf32, #tpu.memory_space<vmem>>, vector<16x128xf32>
    %c0_2 = arith.constant 0 : index
    %c0_3 = arith.constant 0 : index
    %4 = vector.load %arg3[%c0_2, %c0_3] : memref<16x128xf32, #tpu.memory_space<vmem>>, vector<16x128xf32>
    %5 = arith.subf %3, %4 : vector<16x128xf32>
    %6 = arith.mulf %5, %5 : vector<16x128xf32>
    %cst = arith.constant 9.99999996E-13 : f32
    %7 = vector.broadcast %cst : f32 to vector<16x128xf32>
    %8 = arith.addf %6, %7 : vector<16x128xf32>
    %9 = math.sqrt %8 : vector<16x128xf32>
    %c0_4 = arith.constant 0 : index
    %c0_5 = arith.constant 0 : index
    %10 = vector.load %arg5[%c0_4, %c0_5] : memref<16x128xf32, #tpu.memory_space<vmem>>, vector<16x128xf32>
    %11 = arith.addf %10, %9 : vector<16x128xf32>
    %c0_6 = arith.constant 0 : index
    %c0_7 = arith.constant 0 : index
    %12 = vector.load %arg5[%c0_6, %c0_7] : memref<16x128xf32, #tpu.memory_space<vmem>>, vector<16x128xf32>
    tpu.vector_store %arg5[%c0_6, %c0_7], %11 {strides = array<i32>} : memref<16x128xf32, #tpu.memory_space<vmem>>, vector<16x128xf32>,
    %c0_i32_8 = arith.constant 0 : i32
    %13 = arith.cmpi eq, %arg1, %c0_i32_8 : i32
    %14 = arith.extui %13 : i1 to i32
    %c0_i32_9 = arith.constant 0 : i32
    %15 = arith.cmpi ne, %14, %c0_i32_9 : i32
    scf.if %15 {
      %c0_10 = arith.constant 0 : index
      %c0_11 = arith.constant 0 : index
      %16 = vector.load %arg5[%c0_10, %c0_11] : memref<16x128xf32, #tpu.memory_space<vmem>>, vector<16x128xf32>
      %17 = vector.shape_cast %16 : vector<16x128xf32> to vector<1x16x128xf32>
      %cst_12 = arith.constant dense<0.000000e+00> : vector<1xf32>
      %18 = vector.multi_reduction <add>, %17, %cst_12 [1, 2] : vector<1x16x128xf32> to vector<1xf32>
      %19 = vector.shape_cast %18 : vector<1xf32> to vector<1x1x1xf32>
      %20 = vector.extract %19[0, 0, 0] : f32 from vector<1x1x1xf32>
      %c0_13 = arith.constant 0 : index
      %c0_14 = arith.constant 0 : index
      %21 = memref.load %arg4[%c0_13, %c0_14] : memref<1x1xf32, #tpu.memory_space<smem>>
      memref.store %20, %arg4[%c0_13, %c0_14] : memref<1x1xf32, #tpu.memory_space<smem>>
    } else {
    }
    return
  }
  func.func @transform_0(%arg0: i32, %arg1: i32) -> (i32, i32) {
    %c0_i32 = arith.constant 0 : i32
    %0 = arith.muli %arg0, %c0_i32 : i32
    %1 = arith.addi %0, %arg1 : i32
    %c0_i32_0 = arith.constant 0 : i32
    %c0_i32_1 = arith.constant 0 : i32
    return %1, %c0_i32_0 : i32, i32
  }
  func.func @transform_1(%arg0: i32, %arg1: i32) -> (i32, i32) {
    %c0_i32 = arith.constant 0 : i32
    %0 = arith.muli %arg0, %c0_i32 : i32
    %1 = arith.addi %0, %arg1 : i32
    %c0_i32_0 = arith.constant 0 : i32
    %c0_i32_1 = arith.constant 0 : i32
    return %1, %c0_i32_0 : i32, i32
  }
  func.func @transform_2(%arg0: i32, %arg1: i32) -> (i32, i32) {
    %c0_i32 = arith.constant 0 : i32
    %c0_i32_0 = arith.constant 0 : i32
    return %arg0, %c0_i32 : i32, i32
  }
}

</mosaic_0001>

<bundles_post_ra>
// kernel: tpu_custom_call.1
= control target key start
LH: loop header
LB: loop body
LE: loop exit
PB: predicated region body
PF: predicated region fallthrough
CT: control target
= control target key end

     0   :  { %7 = vsyncpa [#allocation4], 0  ;;  %s202_s0 = inlined_call_operand.hbm [shape: f32[16,128], index: 0, kind: input, shape index: {}]   ;;  %s203_s1 = inlined_call_operand.hbm [shape: f32[16,128], index: 1, kind: input, shape index: {}]   ;;  %s204_s2 = inlined_call_operand.hbm [shape: f32[1,1], index: 2, kind: output, shape index: {}]  }
   0x1   :  { %8 = vsyncpa [#allocation7], 0 }
   0x2   :  { %9 = vsyncpa [#allocation5], 0  ;;  %s173_s9 = smov [#allocation3]  }
   0x3   :  { %s15_s10 = sshll.u32 %s173_s9, 4  ;;  %s16_s10 = int_to_ptr.vmem [resolvable:$true] %s15_s10 }
   0x4   :  { %s127_s11 = scalar_lea.vmem %s16_s10, 256  ;;  %p132_p1 = scmp.lt.s32.totalorder %s16_s10, %s16_s10 }
   0x5   :  { %p128_p0 = scmp.ne.s32.totalorder %s16_s10, %s127_s11  ;;  %p133_p2 = scmp.lt.s32.totalorder %s127_s11, %s127_s11 }
   0x7   :  { %p134_p3 = por %p133_p2, %p132_p1 }
   0x9   :  { %p135_p4 = pnand %p134_p3, %p128_p0 }
   0xb   :  { %138 = shalt.err (!%p135_p4)
}
   0xc   :  { %s174_s12 = smov 128   ;;  %s175_s13 = smov 8  }
   0xd   :  { %21 = dma.hbm_to_vmem [thread:$0]  %s202_s0, 256, %s16_s10, [#allocation4], %s174_s12, %s174_s12, %s175_s13  }
   0xe   :  { %s176_s16 = smov [#allocation6]  }
   0xf   :  { %s27_s17 = sshll.u32 %s176_s16, 4  ;;  %s28_s17 = int_to_ptr.vmem [resolvable:$true] %s27_s17 }
  0x10   :  { %s147_s18 = scalar_lea.vmem %s28_s17, 256  ;;  %p152_p6 = scmp.lt.s32.totalorder %s28_s17, %s28_s17 }
  0x11   :  { %p148_p5 = scmp.ne.s32.totalorder %s28_s17, %s147_s18  ;;  %p153_p7 = scmp.lt.s32.totalorder %s147_s18, %s147_s18 }
  0x13   :  { %p154_p8 = por %p153_p7, %p152_p6 }
  0x15   :  { %p155_p9 = pnand %p154_p8, %p148_p5 }
  0x17   :  { %158 = shalt.err (!%p155_p9)
}
  0x18   :  { %33 = dma.hbm_to_vmem [thread:$0]  %s203_s1, 256, %s28_s17, [#allocation7], %s174_s12, %s174_s12, %s175_s13  }
  0x19   :  { %167 = dma.done.wait [#allocation4], 256  }
  0x1a   :  { %168 = vsyncadd [#allocation4], 4294967040 }
  0x1b   :  { %169 = dma.done.wait [#allocation7], 256  }
  0x1c   :  { %170 = vsyncadd [#allocation7], 4294967040  ;;  %v46_v0 = vld [vmem:[#allocation3] sm:$0xff]  ;;  %v47_v1 = vld [vmem:[#allocation3 + $0x8] sm:$0xff]  ;;  %s177_s1 = smov [#allocation8]  }
  0x1d   :  { %v48_v2 = vld [vmem:[#allocation6] sm:$0xff]  ;;  %v49_v3 = vld [vmem:[#allocation6 + $0x8] sm:$0xff] }
  0x1e   :  { %v50_v4 = vsub.f32 %v46_v0, %v48_v2  ;;  %v51_v5 = vsub.f32 %v47_v1, %v49_v3 }
  0x20   :  { %v52_v6 = vmul.f32 %v50_v4, %v50_v4  ;;  %v53_v7 = vmul.f32 %v51_v5, %v51_v5 }
  0x22   :  { %v54_v8 = vadd.f32 1e-12, %v52_v6  ;;  %v55_v9 = vadd.f32 1e-12, %v53_v7 }
  0x24   :  { %115 = vrsqrt.f32 %v54_v8  ;;  %vm58_vm0 = vcmp.eq.f32.partialorder %v54_v8, inf  ;;  %v61_v11 = vand.u32 2147483648, %v54_v8  ;;  %vm60_vm1 = vcmp.eq.f32.partialorder %v54_v8, 0.0 }
  0x25   :  { %117 = vrsqrt.f32 %v55_v9  ;;  %vm65_vm2 = vcmp.eq.f32.partialorder %v55_v9, inf  ;;  %v68_v14 = vand.u32 2147483648, %v55_v9  ;;  %vm67_vm3 = vcmp.eq.f32.partialorder %v55_v9, 0.0 }
  0x31   :  { %v116_v10 = vpop.eup %115 }
  0x32   :  { %v118_v12 = vpop.eup %117  ;;  %v57_v13 = vmul.f32 %v116_v10, %v54_v8 }
  0x33   :  { %v64_v15 = vmul.f32 %v118_v12, %v55_v9 }
  0x34   :  { %v59_v16 = vsel %vm58_vm0, %v54_v8, %v57_v13 }
  0x35   :  { %v62_v17 = vsel %vm60_vm1, %v61_v11, %v59_v16  ;;  %v66_v18 = vsel %vm65_vm2, %v55_v9, %v64_v15 }
  0x36   :  { %v69_v19 = vsel %vm67_vm3, %v68_v14, %v66_v18 }
  0x37   :  { %v81_v20 = vadd.f32 %v69_v19, %v62_v17 }
  0x39   :  { %82 = vadd.xlane.f32.xlu0 %v81_v20 }
  0xc2   :  { %v83_v21 = vpop.xlane.xlu0 %82 }
  0xc3   :  { %v84_v22 = vrot.slane %v83_v21, 4 }
  0xc5   :  { %v85_v23 = vadd.f32 %v84_v22, %v83_v21 }
  0xc7   :  { %v86_v24 = vrot.slane %v85_v23, 2 }
  0xc9   :  { %v87_v25 = vadd.f32 %v86_v24, %v85_v23 }
  0xcb   :  { %v88_v26 = vrot.slane %v87_v25, 1 }
  0xcd   :  { %v89_v27 = vadd.f32 %v88_v26, %v87_v25 }
  0xcf   :  { %108 = vpush %v89_v27 }
 0x100   :  { %s109_s0 = spop %108 }
 0x101   :  { %92 = sst [smem:[#allocation8]] %s109_s0 }
 0x102   :  { %100 = dma.smem_to_hbm %s177_s1, 16, %s204_s2, [#allocation5]  }
 0x103   :  { %171 = dma.done.wait [#allocation5], 16  }
 0x104   :  { %172 = vsyncadd [#allocation5], 4294967280 }
 0x105   :  { %104 = sfence }
 0x106   :  { %105 = vsyncpa [#allocation4], 1 }
 0x107   :  { %106 = vsyncpa [#allocation7], 1 }
 0x108   :  { %107 = vsyncpa [#allocation5], 1 }

</bundles_post_ra>
